<compile_context>
chip_gen: v7x
topology: tpu7x:2x2x1
jax: 0.10.0
libtpu: 0.0.40
codegen_flags: <defaults>
</compile_context>

<pallas_src>
import functools

import jax
import jax.numpy as jnp
import jax.scipy.stats as jstats
from jax import lax
from jax.experimental import pallas as pl
from jax.experimental.pallas import tpu as pltpu


# ------------------------------------------------------------------ weights

def gaussian_kernel_3x3(nsig_scalar):
    """Replicates get_kernel(kernlen=3, nsig) from the PyTorch code."""
    kernlen = 3
    interval = (2.0 * nsig_scalar + 1.0) / kernlen
    x = jnp.linspace(-nsig_scalar - interval / 2.0,
                     nsig_scalar + interval / 2.0, kernlen + 1)
    cdf = jstats.norm.cdf(x)
    kern1d = jnp.diff(cdf)
    kernel_raw = jnp.sqrt(jnp.outer(kern1d, kern1d))
    return (kernel_raw / kernel_raw.sum()).astype(jnp.float32)


def make_weight(kernel3x3, c):
    """weight = kernel.unsqueeze(0).unsqueeze(0).repeat(c, c, 1, 1) -> (c, c, 3, 3)."""
    return jnp.tile(kernel3x3[None, None, :, :], (c, c, 1, 1))


def _conv_matrix(g, n_in, n_out):
    """Banded matrix M (n_in, n_out): M[c, j] = g[c - 2j + 1] (3-tap, stride 2,
    pad 1 folded in; out-of-range taps land on the zero-padding -> 0)."""
    c = jnp.arange(n_in)[:, None]
    j = jnp.arange(n_out)[None, :]
    t = c - 2 * j + 1
    valid = (t >= 0) & (t <= 2)
    return jnp.where(valid, g[jnp.clip(t, 0, 2)], 0.0).astype(jnp.float32)


# ------------------------------------------------------------------ kernel

def _psf_down_kernel(a_ref, b_ref, x_ref, o_ref):
    # a_ref: VMEM (Hout, H)        f32   row-conv matrix (pad+stride folded in)
    # b_ref: VMEM (W, Wout)        f32   col-conv matrix
    # x_ref: VMEM (Cin, H, W)      x dt  one batch item (N squeezed)
    # o_ref: VMEM (c_out, Hout, Wout) x dt
    #
    # 1) channel-sum (replicated-weight identity), f32 accumulation (VPU;
    #    explicit f32 upcast so bf16 inputs stay correct on v5e).
    s = x_ref[0].astype(jnp.float32)
    for ci in range(1, x_ref.shape[0]):
        s = s + x_ref[ci].astype(jnp.float32)
    # 2) separable 3x3 / stride-2 / pad-1 conv as two tiny matmuls.
    t = jnp.dot(s, b_ref[...], preferred_element_type=jnp.float32)      # (H, Wout)
    y = jnp.dot(a_ref[...], t, preferred_element_type=jnp.float32)      # (Hout, Wout)
    # 3) broadcast to every output channel + cast, stored straight to o_ref.
    yc = y.astype(o_ref.dtype)
    for co in range(o_ref.shape[0]):
        o_ref[co] = yc


# ------------------------------------------------------------------ wrapper

@functools.partial(jax.jit, static_argnums=(2,))
def r_psf_down(x_nchw, kernel3x3, c_out):
    """conv2d(x, replicate(kernel3x3, c_out, c_in), stride=2, padding=1); NCHW.

    NOTE: relies on (a) the weight being the same 3x3 filter for every
    (co, ci) pair (requires_grad=False in the PyTorch source) and (b) the
    rank-1 structure of get_kernel's Gaussian (kernel == outer(g, g) exactly
    by construction).  If either ever changes, this shortcut is invalid.
    """
    N, Cin, H, W = x_nchw.shape
    Hout = (H + 2 * 1 - 3) // 2 + 1
    Wout = (W + 2 * 1 - 3) // 2 + 1

    # Separable factor: kernel[i, j] = g[i] * g[j] with sum(g) == 1.
    g = jnp.sqrt(jnp.diagonal(kernel3x3)).astype(jnp.float32)
    g = g / jnp.sum(g)

    a_mat = _conv_matrix(g, H, Hout).T        # (Hout, H)  rows: pad+stride-2
    b_mat = _conv_matrix(g, W, Wout)          # (W, Wout)  cols: pad+stride-2

    out = pl.pallas_call(
        _psf_down_kernel,
        out_shape=jax.ShapeDtypeStruct((N, c_out, Hout, Wout), x_nchw.dtype),
        grid_spec=pltpu.PrefetchScalarGridSpec(
            num_scalar_prefetch=0,
            grid=(N,),
            in_specs=[
                pl.BlockSpec((Hout, H), lambda n: (0, 0)),          # constant A
                pl.BlockSpec((W, Wout), lambda n: (0, 0)),          # constant B
                pl.BlockSpec((None, Cin, H, W),                     # one batch item
                             lambda n: (n, 0, 0, 0)),
            ],
            out_specs=pl.BlockSpec((None, c_out, Hout, Wout),
                                   lambda n: (n, 0, 0, 0)),
        ),
        compiler_params=pltpu.CompilerParams(
            dimension_semantics=("parallel",),   # batch items independent -> 2 TCs on v7x
        ),
    )(a_mat, b_mat, x_nchw)
    return out


# ------------------------------------------------------------------ main

if __name__ == "__main__":
    key = jax.random.PRNGKey(0)
    k_nsig, k_x = jax.random.split(key)

    C = 4
    # nn.Parameter(torch.rand([1]))  ->  deterministic uniform in [0, 1)
    nsig = jax.random.uniform(k_nsig, (1,), dtype=jnp.float32)
    # torch.max(nsig, 0)[0] on a length-1 tensor is just nsig[0]
    kernel3 = gaussian_kernel_3x3(nsig[0])                  # (3, 3)
    weight = make_weight(kernel3, C)                        # (C, C, 3, 3)

    x = jax.random.normal(k_x, (2, C, 16, 16), dtype=jnp.float32)  # NCHW input

    out = r_psf_down(x, kernel3, C)
    out = jax.block_until_ready(out)

    # sanity check against XLA's conv with the full replicated weight
    # (same semantics as torch.nn.functional.conv2d)
    ref = lax.conv_general_dilated(
        x, weight, window_strides=(2, 2), padding=((1, 1), (1, 1)),
        dimension_numbers=("NCHW", "OIHW", "NCHW"))
    ref = jax.block_until_ready(ref)

    assert out.shape == (2, C, 8, 8), out.shape
    err = float(jnp.max(jnp.abs(out - ref)))
    assert jnp.allclose(out, ref, atol=5e-5, rtol=1e-5), err

    print("KERNEL_OK")
</pallas_src>

<mosaic_0001>
module attributes {stable_mosaic.version = 11 : i64} {
  func.func @_psf_down_kernel(%arg0: i32, %arg1: memref<8x16xf32, #tpu.memory_space<vmem>>, %arg2: memref<16x8xf32, #tpu.memory_space<vmem>>, %arg3: memref<1x4x16x16xf32, #tpu.memory_space<vmem>>, %arg4: memref<1x4x8x8xf32, #tpu.memory_space<vmem>>) attributes {dimension_semantics = [#tpu.dimension_semantics<parallel>], iteration_bounds = array<i64: 2>, scalar_prefetch = 0 : i64, scratch_operands = 0 : i64, tpu.core_type = #tpu.core_type<tc>, window_params = [{pipeline_mode = #tpu.pipeline_mode<synchronous>, transform_indices = @transform_0, window_bounds = array<i64: 8, 16>}, {pipeline_mode = #tpu.pipeline_mode<synchronous>, transform_indices = @transform_1, window_bounds = array<i64: 16, 8>}, {transform_indices = @transform_2, window_bounds = array<i64: 1, 4, 16, 16>}, {transform_indices = @transform_3, window_bounds = array<i64: 1, 4, 8, 8>}]} {
    %c0 = arith.constant 0 : index
    %c0_0 = arith.constant 0 : index
    %c0_1 = arith.constant 0 : index
    %c0_2 = arith.constant 0 : index
    %0 = vector.load %arg3[%c0, %c0_0, %c0_1, %c0_2] : memref<1x4x16x16xf32, #tpu.memory_space<vmem>>, vector<1x1x16x16xf32>
    %1 = vector.shape_cast %0 : vector<1x1x16x16xf32> to vector<16x16xf32>
    %c0_3 = arith.constant 0 : index
    %c1 = arith.constant 1 : index
    %c0_4 = arith.constant 0 : index
    %c0_5 = arith.constant 0 : index
    %2 = vector.load %arg3[%c0_3, %c1, %c0_4, %c0_5] : memref<1x4x16x16xf32, #tpu.memory_space<vmem>>, vector<1x1x16x16xf32>
    %3 = vector.shape_cast %2 : vector<1x1x16x16xf32> to vector<16x16xf32>
    %4 = arith.addf %1, %3 : vector<16x16xf32>
    %c0_6 = arith.constant 0 : index
    %c2 = arith.constant 2 : index
    %c0_7 = arith.constant 0 : index
    %c0_8 = arith.constant 0 : index
    %5 = vector.load %arg3[%c0_6, %c2, %c0_7, %c0_8] : memref<1x4x16x16xf32, #tpu.memory_space<vmem>>, vector<1x1x16x16xf32>
    %6 = vector.shape_cast %5 : vector<1x1x16x16xf32> to vector<16x16xf32>
    %7 = arith.addf %4, %6 : vector<16x16xf32>
    %c0_9 = arith.constant 0 : index
    %c3 = arith.constant 3 : index
    %c0_10 = arith.constant 0 : index
    %c0_11 = arith.constant 0 : index
    %8 = vector.load %arg3[%c0_9, %c3, %c0_10, %c0_11] : memref<1x4x16x16xf32, #tpu.memory_space<vmem>>, vector<1x1x16x16xf32>
    %9 = vector.shape_cast %8 : vector<1x1x16x16xf32> to vector<16x16xf32>
    %10 = arith.addf %7, %9 : vector<16x16xf32>
    %c0_12 = arith.constant 0 : index
    %c0_13 = arith.constant 0 : index
    %11 = vector.load %arg2[%c0_12, %c0_13] : memref<16x8xf32, #tpu.memory_space<vmem>>, vector<16x8xf32>
    %cst = arith.constant dense<0.000000e+00> : vector<16x8xf32>
    %12 = tpu.matmul %10, %11, %cst {dimension_numbers = #tpu.dot_dimension_numbers<[1], [0], [0], [1], [0, 0, 1, 1], [], []>} : vector<16x16xf32>, vector<16x8xf32>, vector<16x8xf32> -> vector<16x8xf32>
    %c0_14 = arith.constant 0 : index
    %c0_15 = arith.constant 0 : index
    %13 = vector.load %arg1[%c0_14, %c0_15] : memref<8x16xf32, #tpu.memory_space<vmem>>, vector<8x16xf32>
    %cst_16 = arith.constant dense<0.000000e+00> : vector<8x8xf32>
    %14 = tpu.matmul %13, %12, %cst_16 {dimension_numbers = #tpu.dot_dimension_numbers<[1], [0], [0], [1], [0, 0, 1, 1], [], []>} : vector<8x16xf32>, vector<16x8xf32>, vector<8x8xf32> -> vector<8x8xf32>
    %c0_17 = arith.constant 0 : index
    %c0_18 = arith.constant 0 : index
    %c0_19 = arith.constant 0 : index
    %c0_20 = arith.constant 0 : index
    %15 = vector.load %arg4[%c0_17, %c0_18, %c0_19, %c0_20] : memref<1x4x8x8xf32, #tpu.memory_space<vmem>>, vector<1x1x8x8xf32>
    %16 = vector.shape_cast %15 : vector<1x1x8x8xf32> to vector<8x8xf32>
    %17 = vector.shape_cast %14 : vector<8x8xf32> to vector<1x1x8x8xf32>
    tpu.vector_store %arg4[%c0_17, %c0_18, %c0_19, %c0_20], %17 {strides = array<i32>} : memref<1x4x8x8xf32, #tpu.memory_space<vmem>>, vector<1x1x8x8xf32>,
    %c0_21 = arith.constant 0 : index
    %c1_22 = arith.constant 1 : index
    %c0_23 = arith.constant 0 : index
    %c0_24 = arith.constant 0 : index
    %18 = vector.load %arg4[%c0_21, %c1_22, %c0_23, %c0_24] : memref<1x4x8x8xf32, #tpu.memory_space<vmem>>, vector<1x1x8x8xf32>
    %19 = vector.shape_cast %18 : vector<1x1x8x8xf32> to vector<8x8xf32>
    %20 = vector.shape_cast %14 : vector<8x8xf32> to vector<1x1x8x8xf32>
    tpu.vector_store %arg4[%c0_21, %c1_22, %c0_23, %c0_24], %20 {strides = array<i32>} : memref<1x4x8x8xf32, #tpu.memory_space<vmem>>, vector<1x1x8x8xf32>,
    %c0_25 = arith.constant 0 : index
    %c2_26 = arith.constant 2 : index
    %c0_27 = arith.constant 0 : index
    %c0_28 = arith.constant 0 : index
    %21 = vector.load %arg4[%c0_25, %c2_26, %c0_27, %c0_28] : memref<1x4x8x8xf32, #tpu.memory_space<vmem>>, vector<1x1x8x8xf32>
    %22 = vector.shape_cast %21 : vector<1x1x8x8xf32> to vector<8x8xf32>
    %23 = vector.shape_cast %14 : vector<8x8xf32> to vector<1x1x8x8xf32>
    tpu.vector_store %arg4[%c0_25, %c2_26, %c0_27, %c0_28], %23 {strides = array<i32>} : memref<1x4x8x8xf32, #tpu.memory_space<vmem>>, vector<1x1x8x8xf32>,
    %c0_29 = arith.constant 0 : index
    %c3_30 = arith.constant 3 : index
    %c0_31 = arith.constant 0 : index
    %c0_32 = arith.constant 0 : index
    %24 = vector.load %arg4[%c0_29, %c3_30, %c0_31, %c0_32] : memref<1x4x8x8xf32, #tpu.memory_space<vmem>>, vector<1x1x8x8xf32>
    %25 = vector.shape_cast %24 : vector<1x1x8x8xf32> to vector<8x8xf32>
    %26 = vector.shape_cast %14 : vector<8x8xf32> to vector<1x1x8x8xf32>
    tpu.vector_store %arg4[%c0_29, %c3_30, %c0_31, %c0_32], %26 {strides = array<i32>} : memref<1x4x8x8xf32, #tpu.memory_space<vmem>>, vector<1x1x8x8xf32>,
    return
  }
  func.func @transform_0(%arg0: i32) -> (i32, i32) {
    %c0_i32 = arith.constant 0 : i32
    %c0_i32_0 = arith.constant 0 : i32
    %c0_i32_1 = arith.constant 0 : i32
    return %c0_i32, %c0_i32_0 : i32, i32
  }
  func.func @transform_1(%arg0: i32) -> (i32, i32) {
    %c0_i32 = arith.constant 0 : i32
    %c0_i32_0 = arith.constant 0 : i32
    %c0_i32_1 = arith.constant 0 : i32
    return %c0_i32, %c0_i32_0 : i32, i32
  }
  func.func @transform_2(%arg0: i32) -> (i32, i32, i32, i32) {
    %c0_i32 = arith.constant 0 : i32
    %c0_i32_0 = arith.constant 0 : i32
    %c0_i32_1 = arith.constant 0 : i32
    %c0_i32_2 = arith.constant 0 : i32
    return %arg0, %c0_i32, %c0_i32_0, %c0_i32_1 : i32, i32, i32, i32
  }
  func.func @transform_3(%arg0: i32) -> (i32, i32, i32, i32) {
    %c0_i32 = arith.constant 0 : i32
    %c0_i32_0 = arith.constant 0 : i32
    %c0_i32_1 = arith.constant 0 : i32
    %c0_i32_2 = arith.constant 0 : i32
    return %arg0, %c0_i32, %c0_i32_0, %c0_i32_1 : i32, i32, i32, i32
  }
}

</mosaic_0001>

<bundles_post_ra>
// kernel: r_psf_down.1
= control target key start
LH: loop header
LB: loop body
LE: loop exit
PB: predicated region body
PF: predicated region fallthrough
CT: control target
= control target key end

     0   :  { %8 = vsyncpa [#allocation3], 0  ;;  %s731_s0 = inlined_call_operand.vmem [shape: f32[8,16], index: 0, kind: input, shape index: {}]   ;;  %s732_s1 = inlined_call_operand.vmem [shape: f32[16,8], index: 1, kind: input, shape index: {}]   ;;  %s733_s2 = inlined_call_operand.vmem [shape: f32[2,4,16,16], index: 2, kind: input, shape index: {}]   ;;  %s734_s3 = inlined_call_operand.hbm [shape: f32[2,4,8,8], index: 3, kind: output, shape index: {}]  }
   0x1   :  { %10 = vsyncpa [#allocation3 + $0x1], 0  ;;  %s616_s12 = smov 0   ;;  %s618_s13 = smov 0  }
   0x2   :  { %s620_s14 = smov 0   ;;  %s622_s15 = smov 0  }
   0x3 LB: > { %s637_s16 = sadd.s32 4294967295, %s588_s15   ;;  %s428_s17 = sadd.s32 4294967294, %s588_s15   ;;  %s588_s15 = sphi %s622_s15, %s740_s15   ;;  %s584_s14 = sphi %s620_s14, %s739_s14   ;;  %s580_s13 = sphi %s618_s13, %s738_s13   ;;  %s576_s12 = sphi %s616_s12, %s737_s12  }
   0x4   : > { %s641_s18 = sadd.s32 1, %s588_s15   ;;  %s91_s19 = sadd.s32 1, %s584_s14 }
   0x5   : > { %s88_s20 = ssub.s32 %s588_s15, %s641_s18  ;;  %p101_p0 = scmp.ne.s32.totalorder %s584_s14, %s580_s13 }
   0x6   : > { %p89_p1 = scmp.eq.s32.totalorder %s88_s20, 0  ;;  %p102_p2 = scmp.eq.s32.totalorder %s637_s16, 1 }
   0x7   : > { %p107_p3 = scmp.ne.s32.totalorder %s580_s13, %s576_s12  ;;  %p108_p4 = scmp.eq.s32.totalorder %s428_s17, 1 }
   0x8   : > { %s652_s21 = scalar_select %p89_p1, %s584_s14, %s91_s19  }
   0x9   : > { %p654_p5 = por %p102_p2, %p101_p0  ;;  %p658_p6 = por %p108_p4, %p107_p3 }
   0xa   : > { %p431_p7 = scmp.ge.s32.totalorder %s588_s15, 1  ;;  %p140_p8 = scmp.lt.s32.totalorder %s588_s15, 3 }
   0xc   : > { %p141_p9 = pnand %p431_p7, %p140_p8 }
   0xd   : > { %v186_v0 = vld [vmem:[%s732_s1] sm:$0xff] (!%p141_p9)  ;;  %v187_v1 = vld [vmem:[%s732_s1 + $0x8] sm:$0xff] (!%p141_p9)  ;;  %p164_p10 = scmp.lt.s32.totalorder (!%p141_p9), %s637_s16, 1  ;;  %vm188_vm0 = vcmask (!%p141_p9), 130048   ;;  %v590_v17 = vmov (!%p141_p9), 0.0|0.0   ;;  %vm591_vm1 = vmmov (!%p141_p9), 0  }
   0xe   : > { %144 = sbr.rel (%p141_p9) target bundleno = 479 (0x1df), region = 32  ;;  %v475_v2 = vpack.c.bf16 (!%p141_p9), %v187_v1, %v186_v0  ;;  %479 = vmatprep.subr.bf16.mxu1 (!%p141_p9), %v590_v17  ;;  %v592_v18 = vmov (!%p141_p9), 0.0   ;;  %v270_v22 = vld [vmem:[%s731_s0] sm:$0xff] (!%p141_p9)  ;;  %s161_s8 = sand.u32 (!%p141_p9), 1, %s580_s13   ;;  %vm344_vm2 = vcmask (!%p141_p9), 64512  }
   0xf   : > { %472 = vmatprep.mubr.msk.f32.mxu1 (!%p141_p9), %vm591_vm1, %v592_v18  ;;  %s432_s9 = sshll.u32 (!%p141_p9), %s161_s8, 5  ;;  %s453_s17 = sshll.u32 (!%p141_p9), %s637_s16, 9 }
  0x10   : > { %476 = vmatprep.subr.bf16.mxu0 (!%p141_p9), %v475_v2  ;;  %s163_s10 = scalar_lea.vmem (!%p141_p9), [#allocation2], %s432_s9  ;;  %s688_s24 = scalar_lea.hbm (!%p141_p9), %s734_s3, %s453_s17 }
  0x11   : > { %478 = vmatpush3.bf16.msra.mxu0 (!%p141_p9), %v475_v2  ;;  %s366_s11 = sshll.u32 (!%p141_p9), %s163_s10, 4  ;;  %s690_s25 = scalar_lea.sflag (!%p141_p9), [#allocation3], %s161_s8  ;;  %s683_s11 = int_to_ptr.vmem [resolvable:$true] %s366_s11 }
  0x12   : > { %s593_s26 = smov (!%p141_p9), [#allocation2]  }
  0x13   : > { %s530_s27 = sshll.u32 (!%p141_p9), %s593_s26, 4  ;;  %s531_s27 = int_to_ptr.vmem [resolvable:$false] %s530_s27 }
  0x14   : > { %p533_p0 = scmp.lt.s32.totalorder (!%p141_p9), %s683_s11, %s531_s27 }
  0x15   : > { %s165_s28 = scalar_select %p164_p10, %s637_s16, 1 }
  0x16   : > { %s526_s16 = scalar_lea.vmem %s683_s11, 512 }
  0x17   : > { %s452_s29 = sshll.u32 %s165_s28, 6  ;;  %p527_p11 = scmp.ne.s32.totalorder %s683_s11, %s526_s16 }
  0x18   : > { %s168_s5 = scalar_lea.vmem %s733_s2, %s452_s29  ;;  %s532_s28 = scalar_lea.vmem %s531_s27, 1024 }
  0x19   : > { %v169_v3 = vld [vmem:[%s168_s5] sm:$0xff]  ;;  %v435_v4 = vld [vmem:[%s168_s5 + $0x10] sm:$0xff]  ;;  %v170_v7 = vld [vmem:[%s168_s5 + $0x8] sm:$0xff]  ;;  %p528_p12 = pnand %p527_p11, %p654_p5  ;;  %p534_p1 = scmp.lt.s32.totalorder %s532_s28, %s526_s16 }
  0x1a   : > { %v437_v5 = vld [vmem:[%s168_s5 + $0x20] sm:$0xff]  ;;  %v174_v6 = vadd.f32 %v435_v4, %v169_v3  ;;  %v436_v8 = vld [vmem:[%s168_s5 + $0x18] sm:$0xff]  ;;  %v439_v9 = vld [vmem:[%s168_s5 + $0x30] sm:$0xff] }
  0x1b   : > { %v175_v10 = vadd.f32 %v436_v8, %v170_v7  ;;  %v438_v11 = vld [vmem:[%s168_s5 + $0x28] sm:$0xff]  ;;  %v440_v13 = vld [vmem:[%s168_s5 + $0x38] sm:$0xff]  ;;  %p529_p13 = pneg %p528_p12  ;;  %p535_p2 = por %p534_p1, %p533_p0 }
  0x1c   : > { %v179_v12 = vadd.f32 %v437_v5, %v174_v6 }
  0x1d   : > { %v180_v14 = vadd.f32 %v438_v11, %v175_v10  ;;  %p536_p3 = pnand %p535_p2, %p529_p13 }
  0x1e   : > { %v184_v15 = vadd.f32 %v439_v9, %v179_v12 }
  0x1f   : > { %v185_v16 = vadd.f32 %v440_v13, %v180_v14 }
  0x20   : > { %465 = vmatprep.mubr.msk.f32.mxu0 %vm188_vm0, %v184_v15 }
  0x21   : > { %466 = vmatmul.mubr.msk.f32.vlgmr.msra.gmra.mrb[0].mxu0 %vm188_vm0, %v185_v16 }
  0xf4   : > { %v467_v19 = vpop.f32.mrb[0].mxu0 }
  0xf5   : > { %v261_v20 = vpop.f32.mrb[1].mxu0 }
  0xf6   : > { %v480_v21 = vpack.c.bf16 %v467_v19, %v261_v20 }
  0xf8   : > { %481 = vmatpush3.bf16.msra.mxu1 %v480_v21 }
  0xfb   : > { %473 = vmatmul.mubr.msk.f32.vlgmr.msra.gmra.mrb[0].mxu1 %vm188_vm0, %v270_v22 }
 0x1ce   : > { %v340_v23 = vpop.f32.mrb[0].mxu1 }
 0x1cf   : > { %345 = vst.msk [vmem:[%s163_s10] sm:$0xff] %vm344_vm2, %v340_v23  ;;  %444 = vst.msk [vmem:[%s163_s10 + $0x8] sm:$0xff] %vm344_vm2, %v340_v23  ;;  %v474_v24 = vpop.f32.mrb[1].mxu1 }
 0x1d0   : > { %445 = vst.msk [vmem:[%s163_s10 + $0x10] sm:$0xff] %vm344_vm2, %v340_v23  ;;  %446 = vst.msk [vmem:[%s163_s10 + $0x18] sm:$0xff] %vm344_vm2, %v340_v23 }
 0x1d1   : > { %539 = shalt.err (!%p536_p3)
}
 0x1d2   : > { %s540_s29 = scalar_lea.hbm %s688_s24, 512  ;;  %s544_s5 = scalar_lea.hbm %s734_s3, 1024 }
 0x1d3   : > { %p541_p4 = scmp.ne.s32.totalorder %s688_s24, %s540_s29  ;;  %p545_p9 = scmp.lt.u32.totalorder %s688_s24, %s734_s3 }
 0x1d4   : > { %p546_p10 = scmp.lt.u32.totalorder %s544_s5, %s540_s29  ;;  %p548_p12 = scmp.lt.u32.totalorder %s540_s29, %s688_s24 }
 0x1d5   : > { %p542_p7 = pnand %p541_p4, %p654_p5 }
 0x1d6   : > { %p547_p11 = por %p546_p10, %p545_p9 }
 0x1d7   : > { %p543_p8 = pneg %p542_p7 }
 0x1d8   : > { %p549_p13 = por %p548_p12, %p547_p11 }
 0x1da   : > { %p550_p0 = pnand %p549_p13, %p543_p8 }
 0x1dc   : > { %553 = shalt.err (!%p550_p0)
}
 0x1dd   : > { %s594_s8 = smov 128   ;;  %s595_s9 = smov 8  }
 0x1de   : > { %482 = dma.vmem_to_hbm [thread:$0]  (%p654_p5), %s683_s11, 512, %s688_s24, %s690_s25, %s594_s8, %s594_s8, %s595_s9  }
 0x1df PF: > { %p488_p1 = scmp.ge.s32.totalorder %s588_s15, 2  ;;  %s381_s10 = sand.u32 1, %s576_s12  }
 0x1e0   : > { %s382_s17 = scalar_lea.sflag [#allocation3], %s381_s10 }
 0x1e1   : > { %p485_p2 = pnand %p488_p1, %p658_p6 }
 0x1e3   : > { %571 = dma.done.wait (!%p485_p2), %s382_s17, 512  }
 0x1e4   : > { %573 = vsyncadd (!%p485_p2), %s382_s17, 4294966784  ;;  %p13_p3 = scmp.ge.s32.totalorder %s641_s18, 4   ;;  %s737_s12 = smov %s580_s13 }
 0x1e5   : > { %s738_s13 = smov %s584_s14  ;;  %s739_s14 = smov %s652_s21 }
 0x1e6   : > { %s740_s15 = smov %s641_s18  ;;  %15 = sbr.rel (!%p13_p3) target bundleno = 3 (0x3), region = 73 }
 0x1ed   :  { %387 = vsyncpa [#allocation3], 1 }
 0x1ee   :  { %389 = vsyncpa [#allocation3 + $0x1], 1 }

</bundles_post_ra>
